<compile_context>
chip_gen: v5e
topology: v5e:2x2
jax: 0.10.0
libtpu: 0.0.40
codegen_flags: <defaults>
</compile_context>

<pallas_src>
import jax
import jax.numpy as jnp
from jax import lax
from jax.experimental import pallas as pl
from jax.experimental.pallas import tpu as pltpu
import numpy as np

EPS = 1e-5
NEG = -1e30   # stands in for MaxPool1d's implicit -inf padding


# ----------------------------------------------------------------------------
# Kernel
# ----------------------------------------------------------------------------
def incep_kernel(x_ref, w1_ref, b1_ref, wk3_ref, bk3_ref, wk4_ref, bk4_ref,
                 g_ref, be_ref, wb_ref, bb_ref, out_ref, xp_s, xw_s, yw_s):
    N, Cin, L = x_ref.shape
    Cout = w1_ref.shape[1]
    W = L + 3                    # per-sample slot width == length of F.pad(x,(1,2))
    M = N * W                    # packed lane width

    # ---- pack x into zero-padded per-sample slots (single copy of x) ----------
    xp_s[...] = jnp.zeros_like(xp_s)
    for n in range(N):                                      # static, tiny
        xp_s[:, n * W + 1:n * W + 1 + L] = x_ref[n]
    xp = xp_s[...]                                          # (Cin, M)

    # mask of the "real x" columns inside each slot (slot index j in [1, L])
    col = lax.broadcasted_iota(jnp.int32, (1, M), 1)
    mask = None
    for n in range(N):
        m_n = jnp.logical_and(col >= n * W + 1, col <= n * W + L)
        mask = m_n if mask is None else jnp.logical_or(mask, m_n)
    n_valid = float(N * L)

    def relu(y):
        return jnp.maximum(y, 0.0)

    def conv1x1(z, w, b):                                   # (Co,Ci)@(Ci,M) + (Co,1)
        return jnp.dot(w, z, preferred_element_type=jnp.float32) + b

    def bn(y, g, be, masked=True):
        # train-mode BatchNorm1d: biased variance over (batch, length)
        if masked:
            cnt = n_valid
            mean = jnp.sum(jnp.where(mask, y, 0.0), axis=-1, keepdims=True) / cnt
            d = jnp.where(mask, y - mean, 0.0)
        else:                        # branch3's first BN sees the padded length
            cnt = float(M)           # L+3 per sample == every packed column
            mean = jnp.sum(y, axis=-1, keepdims=True) / cnt
            d = y - mean
        var = jnp.sum(d * d, axis=-1, keepdims=True) / cnt
        return (y - mean) * lax.rsqrt(var + EPS) * g + be

    def shifted_views(y, offsets, ws):
        # view_d[:, c] == y[:, c + d].  Out-of-range columns read 0; such
        # columns are only ever consumed at padding positions, never at real
        # output columns (each slot carries >=1 pad left, >=2 pad right).
        ws[...] = jnp.zeros_like(ws)
        ws[:, 1:1 + M] = y
        return [ws[:, 1 + d:1 + d + M] for d in offsets]

    def conv_k(y, w_flat, b, K):
        # K-tap conv folded into one MXU matmul via an im2col sublane stack.
        # w_flat[:, k*C:(k+1)*C] = tap k; out column c = sum_k tap_k @ y[:, c+k-1]
        views = shifted_views(y, [k - 1 for k in range(K)], yw_s)
        stack = jnp.concatenate(views, axis=0)              # (K*Cout, M)
        return jnp.dot(w_flat, stack, preferred_element_type=jnp.float32) + b

    # ---- branch1: Conv1x1 -------------------------------------------------------
    b1 = conv1x1(xp, w1_ref[0], b1_ref[0])

    # ---- branch2: Conv1x1 -> BN -> ReLU -> Conv(k=3,pad=1) -> BN -> ReLU --------
    y2 = relu(bn(conv1x1(xp, w1_ref[1], b1_ref[1]), g_ref[0], be_ref[0]))
    y2 = jnp.where(mask, y2, 0.0)          # the k=3 conv's zero padding (pad=1)
    y2 = conv_k(y2, wk3_ref[...], bk3_ref[...], 3)
    b2 = relu(bn(y2, g_ref[1], be_ref[1]))

    # ---- branch3 (input = F.pad(x,(1,2)) == every packed column) ----------------
    y3 = bn(conv1x1(xp, w1_ref[2], b1_ref[2]), g_ref[2], be_ref[2], masked=False)
    y3 = conv_k(y3, wk4_ref[...], bk4_ref[...], 4)
    y3 = relu(bn(y3, g_ref[3], be_ref[3]))
    b3 = relu(bn(y3, g_ref[4], be_ref[4]))

    # ---- branch4: MaxPool1d(k=3,s=1,pad=1) -> Conv1x1 -> BN -> ReLU -------------
    xneg = jnp.where(mask, xp, NEG)        # "-inf" padding for the max windows
    v_m1, v_p1 = shifted_views(xneg, (-1, 1), xw_s)
    pool = jnp.maximum(jnp.maximum(v_m1, xneg), v_p1)
    pool = jnp.where(mask, pool, 0.0)      # keep invalid columns finite
    b4 = relu(bn(conv1x1(pool, w1_ref[3], b1_ref[3]), g_ref[5], be_ref[5]))

    # ---- concat -> ReLU -> bottleneck Conv1x1 -----------------------------------
    cat = relu(jnp.concatenate([b1, b2, b3, b4], axis=0))   # (4*Cout, M)
    out_p = jnp.dot(wb_ref[...], cat,
                    preferred_element_type=jnp.float32) + bb_ref[...]

    # coalesced stores: one (bn_ch, L) block per sample (vs 4*N partial stores)
    for n in range(N):
        out_ref[n, :, :] = out_p[:, n * W + 1:n * W + 1 + L]


# ----------------------------------------------------------------------------
# Wrapper
# ----------------------------------------------------------------------------
def incep_bottleneck(x, p):
    N, Cin, L = x.shape
    Cout = p["w1x1"].shape[1]
    BNch = p["w_bneck"].shape[0]
    W = L + 3
    M = N * W

    flops = int(2 * M * (4 * Cout * Cin + 3 * Cout * Cout + 4 * Cout * Cout
                         + BNch * 4 * Cout))
    bytes_accessed = int(4 * (x.size + sum(v.size for v in p.values())
                              + N * BNch * L))

    vmem = pl.BlockSpec(memory_space=pltpu.MemorySpace.VMEM)
    return pl.pallas_call(
        incep_kernel,
        out_shape=jax.ShapeDtypeStruct((N, BNch, L), jnp.float32),
        in_specs=[vmem] * 11,
        out_specs=vmem,
        scratch_shapes=[
            pltpu.VMEM((Cin, M), jnp.float32),        # packed / padded x
            pltpu.VMEM((Cin, M + 3), jnp.float32),    # shifted x views (maxpool)
            pltpu.VMEM((Cout, M + 3), jnp.float32),   # shifted views for im2col
        ],
        cost_estimate=pl.CostEstimate(flops=flops, transcendentals=6 * Cout,
                                      bytes_accessed=bytes_accessed),
    )(x, p["w1x1"], p["b1x1"], p["wk3"], p["bk3"], p["wk4"], p["bk4"],
      p["gamma"], p["beta"], p["w_bneck"], p["b_bneck"])


# ----------------------------------------------------------------------------
# Pure-JAX reference (mirrors the PyTorch module) for correctness check.
# ----------------------------------------------------------------------------
def ref_forward(x, p):
    Co = p["w1x1"].shape[1]

    def c1(z, w, b):
        return jnp.einsum("oi,nil->nol", w, z) + b[None]

    def convk(z, w_flat, b, K, pad):
        zp = jnp.pad(z, ((0, 0), (0, 0), (pad, pad)))
        Lo = zp.shape[-1] - K + 1
        acc = b[None]
        for k in range(K):
            acc = acc + jnp.einsum("oi,nil->nol", w_flat[:, k * Co:(k + 1) * Co],
                                   zp[:, :, k:k + Lo])
        return acc

    def bn(y, g, be):
        m = jnp.mean(y, axis=(0, 2), keepdims=True)
        v = jnp.mean((y - m) ** 2, axis=(0, 2), keepdims=True)
        return (y - m) * lax.rsqrt(v + EPS) * g[None] + be[None]

    def relu(y):
        return jnp.maximum(y, 0.0)

    def maxpool3(z):
        zp = jnp.pad(z, ((0, 0), (0, 0), (1, 1)), constant_values=-jnp.inf)
        Lo = z.shape[-1]
        return jnp.maximum(jnp.maximum(zp[:, :, 0:Lo], zp[:, :, 1:Lo + 1]),
                           zp[:, :, 2:Lo + 2])

    x2 = jnp.pad(x, ((0, 0), (0, 0), (1, 2)))

    b1 = c1(x, p["w1x1"][0], p["b1x1"][0])

    y2 = relu(bn(c1(x, p["w1x1"][1], p["b1x1"][1]), p["gamma"][0], p["beta"][0]))
    b2 = relu(bn(convk(y2, p["wk3"], p["bk3"], 3, 1), p["gamma"][1], p["beta"][1]))

    y3 = bn(c1(x2, p["w1x1"][2], p["b1x1"][2]), p["gamma"][2], p["beta"][2])
    y3 = relu(bn(convk(y3, p["wk4"], p["bk4"], 4, 0), p["gamma"][3], p["beta"][3]))
    b3 = relu(bn(y3, p["gamma"][4], p["beta"][4]))

    b4 = relu(bn(c1(maxpool3(x), p["w1x1"][3], p["b1x1"][3]),
                 p["gamma"][5], p["beta"][5]))

    cat = relu(jnp.concatenate([b1, b2, b3, b4], axis=1))
    return jnp.einsum("oi,nil->nol", p["w_bneck"], cat) + p["b_bneck"][None]


# ----------------------------------------------------------------------------
def make_params(key, cin, cout, bnch):
    ks = jax.random.split(key, 10)
    f = jnp.float32
    return {
        # 1x1 conv weights/biases, order [branch1, branch2a, branch3a, branch4]
        "w1x1": 0.5 * jax.random.normal(ks[0], (4, cout, cin), f),
        "b1x1": 0.1 * jax.random.normal(ks[1], (4, cout, 1), f),
        # branch2 second conv (k=3), taps flattened: wk3[:, k*C:(k+1)*C] = W[:, :, k]
        "wk3": 0.3 * jax.random.normal(ks[2], (cout, 3 * cout), f),
        "bk3": 0.1 * jax.random.normal(ks[3], (cout, 1), f),
        # branch3 second conv (k=4), taps flattened the same way
        "wk4": 0.3 * jax.random.normal(ks[4], (cout, 4 * cout), f),
        "bk4": 0.1 * jax.random.normal(ks[5], (cout, 1), f),
        # BN affine params, order [bn2a, bn2b, bn3a, bn3b, bn3c, bn4]
        "gamma": 1.0 + 0.1 * jax.random.normal(ks[6], (6, cout, 1), f),
        "beta": 0.1 * jax.random.normal(ks[7], (6, cout, 1), f),
        # bottleneck 1x1 conv
        "w_bneck": 0.3 * jax.random.normal(ks[8], (bnch, 4 * cout), f),
        "b_bneck": 0.1 * jax.random.normal(ks[9], (bnch, 1), f),
    }


if __name__ == "__main__":
    key = jax.random.PRNGKey(0)
    kx, kp = jax.random.split(key)

    N, Cin, Cout, BNch, L = 2, 4, 8, 16, 16
    x = jax.random.normal(kx, (N, Cin, L), jnp.float32)
    params = make_params(kp, Cin, Cout, BNch)

    out = jax.block_until_ready(incep_bottleneck(x, params))
    ref = jax.block_until_ready(ref_forward(x, params))

    assert out.shape == (N, BNch, L), out.shape
    np.testing.assert_allclose(np.asarray(out), np.asarray(ref),
                               rtol=5e-3, atol=5e-3)
    print("KERNEL_OK")
</pallas_src>

<mosaic_0001>
module attributes {stable_mosaic.version = 11 : i64} {
  func.func @incep_kernel(%arg0: memref<2x4x16xf32, #tpu.memory_space<vmem>>, %arg1: memref<4x8x4xf32, #tpu.memory_space<vmem>>, %arg2: memref<4x8x1xf32, #tpu.memory_space<vmem>>, %arg3: memref<8x24xf32, #tpu.memory_space<vmem>>, %arg4: memref<8x1xf32, #tpu.memory_space<vmem>>, %arg5: memref<8x32xf32, #tpu.memory_space<vmem>>, %arg6: memref<8x1xf32, #tpu.memory_space<vmem>>, %arg7: memref<6x8x1xf32, #tpu.memory_space<vmem>>, %arg8: memref<6x8x1xf32, #tpu.memory_space<vmem>>, %arg9: memref<16x32xf32, #tpu.memory_space<vmem>>, %arg10: memref<16x1xf32, #tpu.memory_space<vmem>>, %arg11: memref<2x16x16xf32, #tpu.memory_space<vmem>>, %arg12: memref<4x38xf32, #tpu.memory_space<vmem>>, %arg13: memref<4x41xf32, #tpu.memory_space<vmem>>, %arg14: memref<8x41xf32, #tpu.memory_space<vmem>>) attributes {dimension_semantics = [], scalar_prefetch = 0 : i64, scratch_operands = 3 : i64, tpu.core_type = #tpu.core_type<tc>} {
    %cst = arith.constant 0.000000e+00 : f32
    %0 = vector.broadcast %cst : f32 to vector<4x38xf32>
    %c0 = arith.constant 0 : index
    %c0_0 = arith.constant 0 : index
    %1 = vector.load %arg12[%c0, %c0_0] : memref<4x38xf32, #tpu.memory_space<vmem>>, vector<4x38xf32>
    tpu.vector_store %arg12[%c0, %c0_0], %0 {strides = array<i32>} : memref<4x38xf32, #tpu.memory_space<vmem>>, vector<4x38xf32>,
    %c0_1 = arith.constant 0 : index
    %c0_2 = arith.constant 0 : index
    %c0_3 = arith.constant 0 : index
    %2 = vector.load %arg0[%c0_1, %c0_2, %c0_3] : memref<2x4x16xf32, #tpu.memory_space<vmem>>, vector<1x4x16xf32>
    %3 = vector.shape_cast %2 : vector<1x4x16xf32> to vector<4x16xf32>
    %c0_4 = arith.constant 0 : index
    %c1 = arith.constant 1 : index
    %4 = vector.load %arg12[%c0_4, %c1] : memref<4x38xf32, #tpu.memory_space<vmem>>, vector<4x16xf32>
    tpu.vector_store %arg12[%c0_4, %c1], %3 {strides = array<i32>} : memref<4x38xf32, #tpu.memory_space<vmem>>, vector<4x16xf32>,
    %c1_5 = arith.constant 1 : index
    %c0_6 = arith.constant 0 : index
    %c0_7 = arith.constant 0 : index
    %5 = vector.load %arg0[%c1_5, %c0_6, %c0_7] : memref<2x4x16xf32, #tpu.memory_space<vmem>>, vector<1x4x16xf32>
    %6 = vector.shape_cast %5 : vector<1x4x16xf32> to vector<4x16xf32>
    %c0_8 = arith.constant 0 : index
    %c20 = arith.constant 20 : index
    %7 = vector.load %arg12[%c0_8, %c20] : memref<4x38xf32, #tpu.memory_space<vmem>>, vector<4x16xf32>
    tpu.vector_store %arg12[%c0_8, %c20], %6 {strides = array<i32>} : memref<4x38xf32, #tpu.memory_space<vmem>>, vector<4x16xf32>,
    %c0_9 = arith.constant 0 : index
    %c0_10 = arith.constant 0 : index
    %8 = vector.load %arg12[%c0_9, %c0_10] : memref<4x38xf32, #tpu.memory_space<vmem>>, vector<4x38xf32>
    %9 = tpu.iota {dimensions = array<i32: 1>} : vector<1x38xi32>
    %c1_i32 = arith.constant 1 : i32
    %10 = vector.broadcast %c1_i32 : i32 to vector<1x38xi32>
    %11 = arith.cmpi sge, %9, %10 : vector<1x38xi32>
    %c16_i32 = arith.constant 16 : i32
    %12 = vector.broadcast %c16_i32 : i32 to vector<1x38xi32>
    %13 = arith.cmpi sle, %9, %12 : vector<1x38xi32>
    %14 = arith.andi %11, %13 : vector<1x38xi1>
    %c20_i32 = arith.constant 20 : i32
    %15 = vector.broadcast %c20_i32 : i32 to vector<1x38xi32>
    %16 = arith.cmpi sge, %9, %15 : vector<1x38xi32>
    %c35_i32 = arith.constant 35 : i32
    %17 = vector.broadcast %c35_i32 : i32 to vector<1x38xi32>
    %18 = arith.cmpi sle, %9, %17 : vector<1x38xi32>
    %19 = arith.andi %16, %18 : vector<1x38xi1>
    %20 = arith.ori %14, %19 : vector<1x38xi1>
    %c0_11 = arith.constant 0 : index
    %c0_12 = arith.constant 0 : index
    %c0_13 = arith.constant 0 : index
    %21 = vector.load %arg1[%c0_11, %c0_12, %c0_13] : memref<4x8x4xf32, #tpu.memory_space<vmem>>, vector<1x8x4xf32>
    %22 = vector.shape_cast %21 : vector<1x8x4xf32> to vector<8x4xf32>
    %c0_14 = arith.constant 0 : index
    %c0_15 = arith.constant 0 : index
    %c0_16 = arith.constant 0 : index
    %23 = vector.load %arg2[%c0_14, %c0_15, %c0_16] : memref<4x8x1xf32, #tpu.memory_space<vmem>>, vector<1x8x1xf32>
    %24 = vector.shape_cast %23 : vector<1x8x1xf32> to vector<8x1xf32>
    %cst_17 = arith.constant dense<0.000000e+00> : vector<8x38xf32>
    %25 = tpu.matmul %22, %8, %cst_17 {dimension_numbers = #tpu.dot_dimension_numbers<[1], [0], [0], [1], [0, 0, 1, 1], [], []>} : vector<8x4xf32>, vector<4x38xf32>, vector<8x38xf32> -> vector<8x38xf32>
    %26 = vector.broadcast %24 : vector<8x1xf32> to vector<8x38xf32>
    %27 = arith.addf %25, %26 : vector<8x38xf32>
    %c1_18 = arith.constant 1 : index
    %c0_19 = arith.constant 0 : index
    %c0_20 = arith.constant 0 : index
    %28 = vector.load %arg1[%c1_18, %c0_19, %c0_20] : memref<4x8x4xf32, #tpu.memory_space<vmem>>, vector<1x8x4xf32>
    %29 = vector.shape_cast %28 : vector<1x8x4xf32> to vector<8x4xf32>
    %c1_21 = arith.constant 1 : index
    %c0_22 = arith.constant 0 : index
    %c0_23 = arith.constant 0 : index
    %30 = vector.load %arg2[%c1_21, %c0_22, %c0_23] : memref<4x8x1xf32, #tpu.memory_space<vmem>>, vector<1x8x1xf32>
    %31 = vector.shape_cast %30 : vector<1x8x1xf32> to vector<8x1xf32>
    %cst_24 = arith.constant dense<0.000000e+00> : vector<8x38xf32>
    %32 = tpu.matmul %29, %8, %cst_24 {dimension_numbers = #tpu.dot_dimension_numbers<[1], [0], [0], [1], [0, 0, 1, 1], [], []>} : vector<8x4xf32>, vector<4x38xf32>, vector<8x38xf32> -> vector<8x38xf32>
    %33 = vector.broadcast %31 : vector<8x1xf32> to vector<8x38xf32>
    %34 = arith.addf %32, %33 : vector<8x38xf32>
    %c0_25 = arith.constant 0 : index
    %c0_26 = arith.constant 0 : index
    %c0_27 = arith.constant 0 : index
    %35 = vector.load %arg7[%c0_25, %c0_26, %c0_27] : memref<6x8x1xf32, #tpu.memory_space<vmem>>, vector<1x8x1xf32>
    %36 = vector.shape_cast %35 : vector<1x8x1xf32> to vector<8x1xf32>
    %c0_28 = arith.constant 0 : index
    %c0_29 = arith.constant 0 : index
    %c0_30 = arith.constant 0 : index
    %37 = vector.load %arg8[%c0_28, %c0_29, %c0_30] : memref<6x8x1xf32, #tpu.memory_space<vmem>>, vector<1x8x1xf32>
    %38 = vector.shape_cast %37 : vector<1x8x1xf32> to vector<8x1xf32>
    %cst_31 = arith.constant 0.000000e+00 : f32
    %39 = vector.shape_cast %20 : vector<1x38xi1> to vector<1x38xi1>
    %40 = vector.broadcast %39 : vector<1x38xi1> to vector<8x38xi1>
    %41 = vector.broadcast %cst_31 : f32 to vector<8x38xf32>
    %42 = arith.select %40, %34, %41 : vector<8x38xi1>, vector<8x38xf32>
    %cst_32 = arith.constant dense<0.000000e+00> : vector<8xf32>
    %43 = vector.multi_reduction <add>, %42, %cst_32 [1] : vector<8x38xf32> to vector<8xf32>
    %44 = vector.shape_cast %43 : vector<8xf32> to vector<8x1xf32>
    %cst_33 = arith.constant 3.200000e+01 : f32
    %45 = vector.broadcast %cst_33 : f32 to vector<8x1xf32>
    %46 = arith.divf %44, %45 : vector<8x1xf32>
    %47 = vector.broadcast %46 : vector<8x1xf32> to vector<8x38xf32>
    %48 = arith.subf %34, %47 : vector<8x38xf32>
    %cst_34 = arith.constant 0.000000e+00 : f32
    %49 = vector.shape_cast %20 : vector<1x38xi1> to vector<1x38xi1>
    %50 = vector.broadcast %49 : vector<1x38xi1> to vector<8x38xi1>
    %51 = vector.broadcast %cst_34 : f32 to vector<8x38xf32>
    %52 = arith.select %50, %48, %51 : vector<8x38xi1>, vector<8x38xf32>
    %53 = arith.mulf %52, %52 : vector<8x38xf32>
    %cst_35 = arith.constant dense<0.000000e+00> : vector<8xf32>
    %54 = vector.multi_reduction <add>, %53, %cst_35 [1] : vector<8x38xf32> to vector<8xf32>
    %55 = vector.shape_cast %54 : vector<8xf32> to vector<8x1xf32>
    %cst_36 = arith.constant 3.200000e+01 : f32
    %56 = vector.broadcast %cst_36 : f32 to vector<8x1xf32>
    %57 = arith.divf %55, %56 : vector<8x1xf32>
    %58 = vector.broadcast %46 : vector<8x1xf32> to vector<8x38xf32>
    %59 = arith.subf %34, %58 : vector<8x38xf32>
    %cst_37 = arith.constant 9.99999974E-6 : f32
    %60 = vector.broadcast %cst_37 : f32 to vector<8x1xf32>
    %61 = arith.addf %57, %60 : vector<8x1xf32>
    %62 = math.rsqrt %61 : vector<8x1xf32>
    %63 = vector.broadcast %62 : vector<8x1xf32> to vector<8x38xf32>
    %64 = arith.mulf %59, %63 : vector<8x38xf32>
    %65 = vector.broadcast %36 : vector<8x1xf32> to vector<8x38xf32>
    %66 = arith.mulf %64, %65 : vector<8x38xf32>
    %67 = vector.broadcast %38 : vector<8x1xf32> to vector<8x38xf32>
    %68 = arith.addf %66, %67 : vector<8x38xf32>
    %cst_38 = arith.constant 0.000000e+00 : f32
    %69 = vector.broadcast %cst_38 : f32 to vector<8x38xf32>
    %70 = arith.maximumf %68, %69 : vector<8x38xf32>
    %cst_39 = arith.constant 0.000000e+00 : f32
    %71 = vector.shape_cast %20 : vector<1x38xi1> to vector<1x38xi1>
    %72 = vector.broadcast %71 : vector<1x38xi1> to vector<8x38xi1>
    %73 = vector.broadcast %cst_39 : f32 to vector<8x38xf32>
    %74 = arith.select %72, %70, %73 : vector<8x38xi1>, vector<8x38xf32>
    %c0_40 = arith.constant 0 : index
    %c0_41 = arith.constant 0 : index
    %75 = vector.load %arg3[%c0_40, %c0_41] : memref<8x24xf32, #tpu.memory_space<vmem>>, vector<8x24xf32>
    %c0_42 = arith.constant 0 : index
    %c0_43 = arith.constant 0 : index
    %76 = vector.load %arg4[%c0_42, %c0_43] : memref<8x1xf32, #tpu.memory_space<vmem>>, vector<8x1xf32>
    %cst_44 = arith.constant 0.000000e+00 : f32
    %77 = vector.broadcast %cst_44 : f32 to vector<8x41xf32>
    %c0_45 = arith.constant 0 : index
    %c0_46 = arith.constant 0 : index
    %78 = vector.load %arg14[%c0_45, %c0_46] : memref<8x41xf32, #tpu.memory_space<vmem>>, vector<8x41xf32>
    tpu.vector_store %arg14[%c0_45, %c0_46], %77 {strides = array<i32>} : memref<8x41xf32, #tpu.memory_space<vmem>>, vector<8x41xf32>,
    %c0_47 = arith.constant 0 : index
    %c1_48 = arith.constant 1 : index
    %79 = vector.load %arg14[%c0_47, %c1_48] : memref<8x41xf32, #tpu.memory_space<vmem>>, vector<8x38xf32>
    tpu.vector_store %arg14[%c0_47, %c1_48], %74 {strides = array<i32>} : memref<8x41xf32, #tpu.memory_space<vmem>>, vector<8x38xf32>,
    %c0_49 = arith.constant 0 : index
    %c0_50 = arith.constant 0 : index
    %80 = vector.load %arg14[%c0_49, %c0_50] : memref<8x41xf32, #tpu.memory_space<vmem>>, vector<8x38xf32>
    %c0_51 = arith.constant 0 : index
    %c1_52 = arith.constant 1 : index
    %81 = vector.load %arg14[%c0_51, %c1_52] : memref<8x41xf32, #tpu.memory_space<vmem>>, vector<8x38xf32>
    %c0_53 = arith.constant 0 : index
    %c2 = arith.constant 2 : index
    %82 = vector.load %arg14[%c0_53, %c2] : memref<8x41xf32, #tpu.memory_space<vmem>>, vector<8x38xf32>
    %83 = tpu.concatenate %80, %81, %82 in 0 : vector<8x38xf32>, vector<8x38xf32>, vector<8x38xf32> -> vector<24x38xf32>
    %cst_54 = arith.constant dense<0.000000e+00> : vector<8x38xf32>
    %84 = tpu.matmul %75, %83, %cst_54 {dimension_numbers = #tpu.dot_dimension_numbers<[1], [0], [0], [1], [0, 0, 1, 1], [], []>} : vector<8x24xf32>, vector<24x38xf32>, vector<8x38xf32> -> vector<8x38xf32>
    %85 = vector.broadcast %76 : vector<8x1xf32> to vector<8x38xf32>
    %86 = arith.addf %84, %85 : vector<8x38xf32>
    %c1_55 = arith.constant 1 : index
    %c0_56 = arith.constant 0 : index
    %c0_57 = arith.constant 0 : index
    %87 = vector.load %arg7[%c1_55, %c0_56, %c0_57] : memref<6x8x1xf32, #tpu.memory_space<vmem>>, vector<1x8x1xf32>
    %88 = vector.shape_cast %87 : vector<1x8x1xf32> to vector<8x1xf32>
    %c1_58 = arith.constant 1 : index
    %c0_59 = arith.constant 0 : index
    %c0_60 = arith.constant 0 : index
    %89 = vector.load %arg8[%c1_58, %c0_59, %c0_60] : memref<6x8x1xf32, #tpu.memory_space<vmem>>, vector<1x8x1xf32>
    %90 = vector.shape_cast %89 : vector<1x8x1xf32> to vector<8x1xf32>
    %cst_61 = arith.constant 0.000000e+00 : f32
    %91 = vector.shape_cast %20 : vector<1x38xi1> to vector<1x38xi1>
    %92 = vector.broadcast %91 : vector<1x38xi1> to vector<8x38xi1>
    %93 = vector.broadcast %cst_61 : f32 to vector<8x38xf32>
    %94 = arith.select %92, %86, %93 : vector<8x38xi1>, vector<8x38xf32>
    %cst_62 = arith.constant dense<0.000000e+00> : vector<8xf32>
    %95 = vector.multi_reduction <add>, %94, %cst_62 [1] : vector<8x38xf32> to vector<8xf32>
    %96 = vector.shape_cast %95 : vector<8xf32> to vector<8x1xf32>
    %cst_63 = arith.constant 3.200000e+01 : f32
    %97 = vector.broadcast %cst_63 : f32 to vector<8x1xf32>
    %98 = arith.divf %96, %97 : vector<8x1xf32>
    %99 = vector.broadcast %98 : vector<8x1xf32> to vector<8x38xf32>
    %100 = arith.subf %86, %99 : vector<8x38xf32>
    %cst_64 = arith.constant 0.000000e+00 : f32
    %101 = vector.shape_cast %20 : vector<1x38xi1> to vector<1x38xi1>
    %102 = vector.broadcast %101 : vector<1x38xi1> to vector<8x38xi1>
    %103 = vector.broadcast %cst_64 : f32 to vector<8x38xf32>
    %104 = arith.select %102, %100, %103 : vector<8x38xi1>, vector<8x38xf32>
    %105 = arith.mulf %104, %104 : vector<8x38xf32>
    %cst_65 = arith.constant dense<0.000000e+00> : vector<8xf32>
    %106 = vector.multi_reduction <add>, %105, %cst_65 [1] : vector<8x38xf32> to vector<8xf32>
    %107 = vector.shape_cast %106 : vector<8xf32> to vector<8x1xf32>
    %cst_66 = arith.constant 3.200000e+01 : f32
    %108 = vector.broadcast %cst_66 : f32 to vector<8x1xf32>
    %109 = arith.divf %107, %108 : vector<8x1xf32>
    %110 = vector.broadcast %98 : vector<8x1xf32> to vector<8x38xf32>
    %111 = arith.subf %86, %110 : vector<8x38xf32>
    %cst_67 = arith.constant 9.99999974E-6 : f32
    %112 = vector.broadcast %cst_67 : f32 to vector<8x1xf32>
    %113 = arith.addf %109, %112 : vector<8x1xf32>
    %114 = math.rsqrt %113 : vector<8x1xf32>
    %115 = vector.broadcast %114 : vector<8x1xf32> to vector<8x38xf32>
    %116 = arith.mulf %111, %115 : vector<8x38xf32>
    %117 = vector.broadcast %88 : vector<8x1xf32> to vector<8x38xf32>
    %118 = arith.mulf %116, %117 : vector<8x38xf32>
    %119 = vector.broadcast %90 : vector<8x1xf32> to vector<8x38xf32>
    %120 = arith.addf %118, %119 : vector<8x38xf32>
    %cst_68 = arith.constant 0.000000e+00 : f32
    %121 = vector.broadcast %cst_68 : f32 to vector<8x38xf32>
    %122 = arith.maximumf %120, %121 : vector<8x38xf32>
    %c2_69 = arith.constant 2 : index
    %c0_70 = arith.constant 0 : index
    %c0_71 = arith.constant 0 : index
    %123 = vector.load %arg1[%c2_69, %c0_70, %c0_71] : memref<4x8x4xf32, #tpu.memory_space<vmem>>, vector<1x8x4xf32>
    %124 = vector.shape_cast %123 : vector<1x8x4xf32> to vector<8x4xf32>
    %c2_72 = arith.constant 2 : index
    %c0_73 = arith.constant 0 : index
    %c0_74 = arith.constant 0 : index
    %125 = vector.load %arg2[%c2_72, %c0_73, %c0_74] : memref<4x8x1xf32, #tpu.memory_space<vmem>>, vector<1x8x1xf32>
    %126 = vector.shape_cast %125 : vector<1x8x1xf32> to vector<8x1xf32>
    %cst_75 = arith.constant dense<0.000000e+00> : vector<8x38xf32>
    %127 = tpu.matmul %124, %8, %cst_75 {dimension_numbers = #tpu.dot_dimension_numbers<[1], [0], [0], [1], [0, 0, 1, 1], [], []>} : vector<8x4xf32>, vector<4x38xf32>, vector<8x38xf32> -> vector<8x38xf32>
    %128 = vector.broadcast %126 : vector<8x1xf32> to vector<8x38xf32>
    %129 = arith.addf %127, %128 : vector<8x38xf32>
    %c2_76 = arith.constant 2 : index
    %c0_77 = arith.constant 0 : index
    %c0_78 = arith.constant 0 : index
    %130 = vector.load %arg7[%c2_76, %c0_77, %c0_78] : memref<6x8x1xf32, #tpu.memory_space<vmem>>, vector<1x8x1xf32>
    %131 = vector.shape_cast %130 : vector<1x8x1xf32> to vector<8x1xf32>
    %c2_79 = arith.constant 2 : index
    %c0_80 = arith.constant 0 : index
    %c0_81 = arith.constant 0 : index
    %132 = vector.load %arg8[%c2_79, %c0_80, %c0_81] : memref<6x8x1xf32, #tpu.memory_space<vmem>>, vector<1x8x1xf32>
    %133 = vector.shape_cast %132 : vector<1x8x1xf32> to vector<8x1xf32>
    %cst_82 = arith.constant dense<0.000000e+00> : vector<8xf32>
    %134 = vector.multi_reduction <add>, %129, %cst_82 [1] : vector<8x38xf32> to vector<8xf32>
    %135 = vector.shape_cast %134 : vector<8xf32> to vector<8x1xf32>
    %cst_83 = arith.constant 3.800000e+01 : f32
    %136 = vector.broadcast %cst_83 : f32 to vector<8x1xf32>
    %137 = arith.divf %135, %136 : vector<8x1xf32>
    %138 = vector.broadcast %137 : vector<8x1xf32> to vector<8x38xf32>
    %139 = arith.subf %129, %138 : vector<8x38xf32>
    %140 = arith.mulf %139, %139 : vector<8x38xf32>
    %cst_84 = arith.constant dense<0.000000e+00> : vector<8xf32>
    %141 = vector.multi_reduction <add>, %140, %cst_84 [1] : vector<8x38xf32> to vector<8xf32>
    %142 = vector.shape_cast %141 : vector<8xf32> to vector<8x1xf32>
    %cst_85 = arith.constant 3.800000e+01 : f32
    %143 = vector.broadcast %cst_85 : f32 to vector<8x1xf32>
    %144 = arith.divf %142, %143 : vector<8x1xf32>
    %145 = vector.broadcast %137 : vector<8x1xf32> to vector<8x38xf32>
    %146 = arith.subf %129, %145 : vector<8x38xf32>
    %cst_86 = arith.constant 9.99999974E-6 : f32
    %147 = vector.broadcast %cst_86 : f32 to vector<8x1xf32>
    %148 = arith.addf %144, %147 : vector<8x1xf32>
    %149 = math.rsqrt %148 : vector<8x1xf32>
    %150 = vector.broadcast %149 : vector<8x1xf32> to vector<8x38xf32>
    %151 = arith.mulf %146, %150 : vector<8x38xf32>
    %152 = vector.broadcast %131 : vector<8x1xf32> to vector<8x38xf32>
    %153 = arith.mulf %151, %152 : vector<8x38xf32>
    %154 = vector.broadcast %133 : vector<8x1xf32> to vector<8x38xf32>
    %155 = arith.addf %153, %154 : vector<8x38xf32>
    %c0_87 = arith.constant 0 : index
    %c0_88 = arith.constant 0 : index
    %156 = vector.load %arg5[%c0_87, %c0_88] : memref<8x32xf32, #tpu.memory_space<vmem>>, vector<8x32xf32>
    %c0_89 = arith.constant 0 : index
    %c0_90 = arith.constant 0 : index
    %157 = vector.load %arg6[%c0_89, %c0_90] : memref<8x1xf32, #tpu.memory_space<vmem>>, vector<8x1xf32>
    %cst_91 = arith.constant 0.000000e+00 : f32
    %158 = vector.broadcast %cst_91 : f32 to vector<8x41xf32>
    %c0_92 = arith.constant 0 : index
    %c0_93 = arith.constant 0 : index
    %159 = vector.load %arg14[%c0_92, %c0_93] : memref<8x41xf32, #tpu.memory_space<vmem>>, vector<8x41xf32>
    tpu.vector_store %arg14[%c0_92, %c0_93], %158 {strides = array<i32>} : memref<8x41xf32, #tpu.memory_space<vmem>>, vector<8x41xf32>,
    %c0_94 = arith.constant 0 : index
    %c1_95 = arith.constant 1 : index
    %160 = vector.load %arg14[%c0_94, %c1_95] : memref<8x41xf32, #tpu.memory_space<vmem>>, vector<8x38xf32>
    tpu.vector_store %arg14[%c0_94, %c1_95], %155 {strides = array<i32>} : memref<8x41xf32, #tpu.memory_space<vmem>>, vector<8x38xf32>,
    %c0_96 = arith.constant 0 : index
    %c0_97 = arith.constant 0 : index
    %161 = vector.load %arg14[%c0_96, %c0_97] : memref<8x41xf32, #tpu.memory_space<vmem>>, vector<8x38xf32>
    %c0_98 = arith.constant 0 : index
    %c1_99 = arith.constant 1 : index
    %162 = vector.load %arg14[%c0_98, %c1_99] : memref<8x41xf32, #tpu.memory_space<vmem>>, vector<8x38xf32>
    %c0_100 = arith.constant 0 : index
    %c2_101 = arith.constant 2 : index
    %163 = vector.load %arg14[%c0_100, %c2_101] : memref<8x41xf32, #tpu.memory_space<vmem>>, vector<8x38xf32>
    %c0_102 = arith.constant 0 : index
    %c3 = arith.constant 3 : index
    %164 = vector.load %arg14[%c0_102, %c3] : memref<8x41xf32, #tpu.memory_space<vmem>>, vector<8x38xf32>
    %165 = tpu.concatenate %161, %162, %163, %164 in 0 : vector<8x38xf32>, vector<8x38xf32>, vector<8x38xf32>, vector<8x38xf32> -> vector<32x38xf32>
    %cst_103 = arith.constant dense<0.000000e+00> : vector<8x38xf32>
    %166 = tpu.matmul %156, %165, %cst_103 {dimension_numbers = #tpu.dot_dimension_numbers<[1], [0], [0], [1], [0, 0, 1, 1], [], []>} : vector<8x32xf32>, vector<32x38xf32>, vector<8x38xf32> -> vector<8x38xf32>
    %167 = vector.broadcast %157 : vector<8x1xf32> to vector<8x38xf32>
    %168 = arith.addf %166, %167 : vector<8x38xf32>
    %c3_104 = arith.constant 3 : index
    %c0_105 = arith.constant 0 : index
    %c0_106 = arith.constant 0 : index
    %169 = vector.load %arg7[%c3_104, %c0_105, %c0_106] : memref<6x8x1xf32, #tpu.memory_space<vmem>>, vector<1x8x1xf32>
    %170 = vector.shape_cast %169 : vector<1x8x1xf32> to vector<8x1xf32>
    %c3_107 = arith.constant 3 : index
    %c0_108 = arith.constant 0 : index
    %c0_109 = arith.constant 0 : index
    %171 = vector.load %arg8[%c3_107, %c0_108, %c0_109] : memref<6x8x1xf32, #tpu.memory_space<vmem>>, vector<1x8x1xf32>
    %172 = vector.shape_cast %171 : vector<1x8x1xf32> to vector<8x1xf32>
    %cst_110 = arith.constant 0.000000e+00 : f32
    %173 = vector.shape_cast %20 : vector<1x38xi1> to vector<1x38xi1>
    %174 = vector.broadcast %173 : vector<1x38xi1> to vector<8x38xi1>
    %175 = vector.broadcast %cst_110 : f32 to vector<8x38xf32>
    %176 = arith.select %174, %168, %175 : vector<8x38xi1>, vector<8x38xf32>
    %cst_111 = arith.constant dense<0.000000e+00> : vector<8xf32>
    %177 = vector.multi_reduction <add>, %176, %cst_111 [1] : vector<8x38xf32> to vector<8xf32>
    %178 = vector.shape_cast %177 : vector<8xf32> to vector<8x1xf32>
    %cst_112 = arith.constant 3.200000e+01 : f32
    %179 = vector.broadcast %cst_112 : f32 to vector<8x1xf32>
    %180 = arith.divf %178, %179 : vector<8x1xf32>
    %181 = vector.broadcast %180 : vector<8x1xf32> to vector<8x38xf32>
    %182 = arith.subf %168, %181 : vector<8x38xf32>
    %cst_113 = arith.constant 0.000000e+00 : f32
    %183 = vector.shape_cast %20 : vector<1x38xi1> to vector<1x38xi1>
    %184 = vector.broadcast %183 : vector<1x38xi1> to vector<8x38xi1>
    %185 = vector.broadcast %cst_113 : f32 to vector<8x38xf32>
    %186 = arith.select %184, %182, %185 : vector<8x38xi1>, vector<8x38xf32>
    %187 = arith.mulf %186, %186 : vector<8x38xf32>
    %cst_114 = arith.constant dense<0.000000e+00> : vector<8xf32>
    %188 = vector.multi_reduction <add>, %187, %cst_114 [1] : vector<8x38xf32> to vector<8xf32>
    %189 = vector.shape_cast %188 : vector<8xf32> to vector<8x1xf32>
    %cst_115 = arith.constant 3.200000e+01 : f32
    %190 = vector.broadcast %cst_115 : f32 to vector<8x1xf32>
    %191 = arith.divf %189, %190 : vector<8x1xf32>
    %192 = vector.broadcast %180 : vector<8x1xf32> to vector<8x38xf32>
    %193 = arith.subf %168, %192 : vector<8x38xf32>
    %cst_116 = arith.constant 9.99999974E-6 : f32
    %194 = vector.broadcast %cst_116 : f32 to vector<8x1xf32>
    %195 = arith.addf %191, %194 : vector<8x1xf32>
    %196 = math.rsqrt %195 : vector<8x1xf32>
    %197 = vector.broadcast %196 : vector<8x1xf32> to vector<8x38xf32>
    %198 = arith.mulf %193, %197 : vector<8x38xf32>
    %199 = vector.broadcast %170 : vector<8x1xf32> to vector<8x38xf32>
    %200 = arith.mulf %198, %199 : vector<8x38xf32>
    %201 = vector.broadcast %172 : vector<8x1xf32> to vector<8x38xf32>
    %202 = arith.addf %200, %201 : vector<8x38xf32>
    %cst_117 = arith.constant 0.000000e+00 : f32
    %203 = vector.broadcast %cst_117 : f32 to vector<8x38xf32>
    %204 = arith.maximumf %202, %203 : vector<8x38xf32>
    %c4 = arith.constant 4 : index
    %c0_118 = arith.constant 0 : index
    %c0_119 = arith.constant 0 : index
    %205 = vector.load %arg7[%c4, %c0_118, %c0_119] : memref<6x8x1xf32, #tpu.memory_space<vmem>>, vector<1x8x1xf32>
    %206 = vector.shape_cast %205 : vector<1x8x1xf32> to vector<8x1xf32>
    %c4_120 = arith.constant 4 : index
    %c0_121 = arith.constant 0 : index
    %c0_122 = arith.constant 0 : index
    %207 = vector.load %arg8[%c4_120, %c0_121, %c0_122] : memref<6x8x1xf32, #tpu.memory_space<vmem>>, vector<1x8x1xf32>
    %208 = vector.shape_cast %207 : vector<1x8x1xf32> to vector<8x1xf32>
    %cst_123 = arith.constant 0.000000e+00 : f32
    %209 = vector.shape_cast %20 : vector<1x38xi1> to vector<1x38xi1>
    %210 = vector.broadcast %209 : vector<1x38xi1> to vector<8x38xi1>
    %211 = vector.broadcast %cst_123 : f32 to vector<8x38xf32>
    %212 = arith.select %210, %204, %211 : vector<8x38xi1>, vector<8x38xf32>
    %cst_124 = arith.constant dense<0.000000e+00> : vector<8xf32>
    %213 = vector.multi_reduction <add>, %212, %cst_124 [1] : vector<8x38xf32> to vector<8xf32>
    %214 = vector.shape_cast %213 : vector<8xf32> to vector<8x1xf32>
    %cst_125 = arith.constant 3.200000e+01 : f32
    %215 = vector.broadcast %cst_125 : f32 to vector<8x1xf32>
    %216 = arith.divf %214, %215 : vector<8x1xf32>
    %217 = vector.broadcast %216 : vector<8x1xf32> to vector<8x38xf32>
    %218 = arith.subf %204, %217 : vector<8x38xf32>
    %cst_126 = arith.constant 0.000000e+00 : f32
    %219 = vector.shape_cast %20 : vector<1x38xi1> to vector<1x38xi1>
    %220 = vector.broadcast %219 : vector<1x38xi1> to vector<8x38xi1>
    %221 = vector.broadcast %cst_126 : f32 to vector<8x38xf32>
    %222 = arith.select %220, %218, %221 : vector<8x38xi1>, vector<8x38xf32>
    %223 = arith.mulf %222, %222 : vector<8x38xf32>
    %cst_127 = arith.constant dense<0.000000e+00> : vector<8xf32>
    %224 = vector.multi_reduction <add>, %223, %cst_127 [1] : vector<8x38xf32> to vector<8xf32>
    %225 = vector.shape_cast %224 : vector<8xf32> to vector<8x1xf32>
    %cst_128 = arith.constant 3.200000e+01 : f32
    %226 = vector.broadcast %cst_128 : f32 to vector<8x1xf32>
    %227 = arith.divf %225, %226 : vector<8x1xf32>
    %228 = vector.broadcast %216 : vector<8x1xf32> to vector<8x38xf32>
    %229 = arith.subf %204, %228 : vector<8x38xf32>
    %cst_129 = arith.constant 9.99999974E-6 : f32
    %230 = vector.broadcast %cst_129 : f32 to vector<8x1xf32>
    %231 = arith.addf %227, %230 : vector<8x1xf32>
    %232 = math.rsqrt %231 : vector<8x1xf32>
    %233 = vector.broadcast %232 : vector<8x1xf32> to vector<8x38xf32>
    %234 = arith.mulf %229, %233 : vector<8x38xf32>
    %235 = vector.broadcast %206 : vector<8x1xf32> to vector<8x38xf32>
    %236 = arith.mulf %234, %235 : vector<8x38xf32>
    %237 = vector.broadcast %208 : vector<8x1xf32> to vector<8x38xf32>
    %238 = arith.addf %236, %237 : vector<8x38xf32>
    %cst_130 = arith.constant 0.000000e+00 : f32
    %239 = vector.broadcast %cst_130 : f32 to vector<8x38xf32>
    %240 = arith.maximumf %238, %239 : vector<8x38xf32>
    %cst_131 = arith.constant -1.000000e+30 : f32
    %241 = vector.shape_cast %20 : vector<1x38xi1> to vector<1x38xi1>
    %242 = vector.broadcast %241 : vector<1x38xi1> to vector<4x38xi1>
    %243 = vector.broadcast %cst_131 : f32 to vector<4x38xf32>
    %244 = arith.select %242, %8, %243 : vector<4x38xi1>, vector<4x38xf32>
    %cst_132 = arith.constant 0.000000e+00 : f32
    %245 = vector.broadcast %cst_132 : f32 to vector<4x41xf32>
    %c0_133 = arith.constant 0 : index
    %c0_134 = arith.constant 0 : index
    %246 = vector.load %arg13[%c0_133, %c0_134] : memref<4x41xf32, #tpu.memory_space<vmem>>, vector<4x41xf32>
    tpu.vector_store %arg13[%c0_133, %c0_134], %245 {strides = array<i32>} : memref<4x41xf32, #tpu.memory_space<vmem>>, vector<4x41xf32>,
    %c0_135 = arith.constant 0 : index
    %c1_136 = arith.constant 1 : index
    %247 = vector.load %arg13[%c0_135, %c1_136] : memref<4x41xf32, #tpu.memory_space<vmem>>, vector<4x38xf32>
    tpu.vector_store %arg13[%c0_135, %c1_136], %244 {strides = array<i32>} : memref<4x41xf32, #tpu.memory_space<vmem>>, vector<4x38xf32>,
    %c0_137 = arith.constant 0 : index
    %c0_138 = arith.constant 0 : index
    %248 = vector.load %arg13[%c0_137, %c0_138] : memref<4x41xf32, #tpu.memory_space<vmem>>, vector<4x38xf32>
    %c0_139 = arith.constant 0 : index
    %c2_140 = arith.constant 2 : index
    %249 = vector.load %arg13[%c0_139, %c2_140] : memref<4x41xf32, #tpu.memory_space<vmem>>, vector<4x38xf32>
    %250 = arith.maximumf %248, %244 : vector<4x38xf32>
    %251 = arith.maximumf %250, %249 : vector<4x38xf32>
    %cst_141 = arith.constant 0.000000e+00 : f32
    %252 = vector.shape_cast %20 : vector<1x38xi1> to vector<1x38xi1>
    %253 = vector.broadcast %252 : vector<1x38xi1> to vector<4x38xi1>
    %254 = vector.broadcast %cst_141 : f32 to vector<4x38xf32>
    %255 = arith.select %253, %251, %254 : vector<4x38xi1>, vector<4x38xf32>
    %c3_142 = arith.constant 3 : index
    %c0_143 = arith.constant 0 : index
    %c0_144 = arith.constant 0 : index
    %256 = vector.load %arg1[%c3_142, %c0_143, %c0_144] : memref<4x8x4xf32, #tpu.memory_space<vmem>>, vector<1x8x4xf32>
    %257 = vector.shape_cast %256 : vector<1x8x4xf32> to vector<8x4xf32>
    %c3_145 = arith.constant 3 : index
    %c0_146 = arith.constant 0 : index
    %c0_147 = arith.constant 0 : index
    %258 = vector.load %arg2[%c3_145, %c0_146, %c0_147] : memref<4x8x1xf32, #tpu.memory_space<vmem>>, vector<1x8x1xf32>
    %259 = vector.shape_cast %258 : vector<1x8x1xf32> to vector<8x1xf32>
    %cst_148 = arith.constant dense<0.000000e+00> : vector<8x38xf32>
    %260 = tpu.matmul %257, %255, %cst_148 {dimension_numbers = #tpu.dot_dimension_numbers<[1], [0], [0], [1], [0, 0, 1, 1], [], []>} : vector<8x4xf32>, vector<4x38xf32>, vector<8x38xf32> -> vector<8x38xf32>
    %261 = vector.broadcast %259 : vector<8x1xf32> to vector<8x38xf32>
    %262 = arith.addf %260, %261 : vector<8x38xf32>
    %c5 = arith.constant 5 : index
    %c0_149 = arith.constant 0 : index
    %c0_150 = arith.constant 0 : index
    %263 = vector.load %arg7[%c5, %c0_149, %c0_150] : memref<6x8x1xf32, #tpu.memory_space<vmem>>, vector<1x8x1xf32>
    %264 = vector.shape_cast %263 : vector<1x8x1xf32> to vector<8x1xf32>
    %c5_151 = arith.constant 5 : index
    %c0_152 = arith.constant 0 : index
    %c0_153 = arith.constant 0 : index
    %265 = vector.load %arg8[%c5_151, %c0_152, %c0_153] : memref<6x8x1xf32, #tpu.memory_space<vmem>>, vector<1x8x1xf32>
    %266 = vector.shape_cast %265 : vector<1x8x1xf32> to vector<8x1xf32>
    %cst_154 = arith.constant 0.000000e+00 : f32
    %267 = vector.shape_cast %20 : vector<1x38xi1> to vector<1x38xi1>
    %268 = vector.broadcast %267 : vector<1x38xi1> to vector<8x38xi1>
    %269 = vector.broadcast %cst_154 : f32 to vector<8x38xf32>
    %270 = arith.select %268, %262, %269 : vector<8x38xi1>, vector<8x38xf32>
    %cst_155 = arith.constant dense<0.000000e+00> : vector<8xf32>
    %271 = vector.multi_reduction <add>, %270, %cst_155 [1] : vector<8x38xf32> to vector<8xf32>
    %272 = vector.shape_cast %271 : vector<8xf32> to vector<8x1xf32>
    %cst_156 = arith.constant 3.200000e+01 : f32
    %273 = vector.broadcast %cst_156 : f32 to vector<8x1xf32>
    %274 = arith.divf %272, %273 : vector<8x1xf32>
    %275 = vector.broadcast %274 : vector<8x1xf32> to vector<8x38xf32>
    %276 = arith.subf %262, %275 : vector<8x38xf32>
    %cst_157 = arith.constant 0.000000e+00 : f32
    %277 = vector.shape_cast %20 : vector<1x38xi1> to vector<1x38xi1>
    %278 = vector.broadcast %277 : vector<1x38xi1> to vector<8x38xi1>
    %279 = vector.broadcast %cst_157 : f32 to vector<8x38xf32>
    %280 = arith.select %278, %276, %279 : vector<8x38xi1>, vector<8x38xf32>
    %281 = arith.mulf %280, %280 : vector<8x38xf32>
    %cst_158 = arith.constant dense<0.000000e+00> : vector<8xf32>
    %282 = vector.multi_reduction <add>, %281, %cst_158 [1] : vector<8x38xf32> to vector<8xf32>
    %283 = vector.shape_cast %282 : vector<8xf32> to vector<8x1xf32>
    %cst_159 = arith.constant 3.200000e+01 : f32
    %284 = vector.broadcast %cst_159 : f32 to vector<8x1xf32>
    %285 = arith.divf %283, %284 : vector<8x1xf32>
    %286 = vector.broadcast %274 : vector<8x1xf32> to vector<8x38xf32>
    %287 = arith.subf %262, %286 : vector<8x38xf32>
    %cst_160 = arith.constant 9.99999974E-6 : f32
    %288 = vector.broadcast %cst_160 : f32 to vector<8x1xf32>
    %289 = arith.addf %285, %288 : vector<8x1xf32>
    %290 = math.rsqrt %289 : vector<8x1xf32>
    %291 = vector.broadcast %290 : vector<8x1xf32> to vector<8x38xf32>
    %292 = arith.mulf %287, %291 : vector<8x38xf32>
    %293 = vector.broadcast %264 : vector<8x1xf32> to vector<8x38xf32>
    %294 = arith.mulf %292, %293 : vector<8x38xf32>
    %295 = vector.broadcast %266 : vector<8x1xf32> to vector<8x38xf32>
    %296 = arith.addf %294, %295 : vector<8x38xf32>
    %cst_161 = arith.constant 0.000000e+00 : f32
    %297 = vector.broadcast %cst_161 : f32 to vector<8x38xf32>
    %298 = arith.maximumf %296, %297 : vector<8x38xf32>
    %299 = tpu.concatenate %27, %122, %240, %298 in 0 : vector<8x38xf32>, vector<8x38xf32>, vector<8x38xf32>, vector<8x38xf32> -> vector<32x38xf32>
    %cst_162 = arith.constant 0.000000e+00 : f32
    %300 = vector.broadcast %cst_162 : f32 to vector<32x38xf32>
    %301 = arith.maximumf %299, %300 : vector<32x38xf32>
    %c0_163 = arith.constant 0 : index
    %c0_164 = arith.constant 0 : index
    %302 = vector.load %arg9[%c0_163, %c0_164] : memref<16x32xf32, #tpu.memory_space<vmem>>, vector<16x32xf32>
    %cst_165 = arith.constant dense<0.000000e+00> : vector<16x38xf32>
    %303 = tpu.matmul %302, %301, %cst_165 {dimension_numbers = #tpu.dot_dimension_numbers<[1], [0], [0], [1], [0, 0, 1, 1], [], []>} : vector<16x32xf32>, vector<32x38xf32>, vector<16x38xf32> -> vector<16x38xf32>
    %c0_166 = arith.constant 0 : index
    %c0_167 = arith.constant 0 : index
    %304 = vector.load %arg10[%c0_166, %c0_167] : memref<16x1xf32, #tpu.memory_space<vmem>>, vector<16x1xf32>
    %305 = vector.broadcast %304 : vector<16x1xf32> to vector<16x38xf32>
    %306 = arith.addf %303, %305 : vector<16x38xf32>
    %307 = vector.extract_strided_slice %306 {offsets = [0, 1], sizes = [16, 16], strides = [1, 1]} : vector<16x38xf32> to vector<16x16xf32>
    %c0_168 = arith.constant 0 : index
    %c0_169 = arith.constant 0 : index
    %c0_170 = arith.constant 0 : index
    %308 = vector.load %arg11[%c0_168, %c0_169, %c0_170] : memref<2x16x16xf32, #tpu.memory_space<vmem>>, vector<1x16x16xf32>
    %309 = vector.shape_cast %308 : vector<1x16x16xf32> to vector<16x16xf32>
    %310 = vector.shape_cast %307 : vector<16x16xf32> to vector<1x16x16xf32>
    tpu.vector_store %arg11[%c0_168, %c0_169, %c0_170], %310 {strides = array<i32>} : memref<2x16x16xf32, #tpu.memory_space<vmem>>, vector<1x16x16xf32>,
    %311 = vector.extract_strided_slice %306 {offsets = [0, 20], sizes = [16, 16], strides = [1, 1]} : vector<16x38xf32> to vector<16x16xf32>
    %c1_171 = arith.constant 1 : index
    %c0_172 = arith.constant 0 : index
    %c0_173 = arith.constant 0 : index
    %312 = vector.load %arg11[%c1_171, %c0_172, %c0_173] : memref<2x16x16xf32, #tpu.memory_space<vmem>>, vector<1x16x16xf32>
    %313 = vector.shape_cast %312 : vector<1x16x16xf32> to vector<16x16xf32>
    %314 = vector.shape_cast %311 : vector<16x16xf32> to vector<1x16x16xf32>
    tpu.vector_store %arg11[%c1_171, %c0_172, %c0_173], %314 {strides = array<i32>} : memref<2x16x16xf32, #tpu.memory_space<vmem>>, vector<1x16x16xf32>,
    return
  }
}

</mosaic_0001>

<bundles_post_ra>
// kernel: tpu_custom_call.1
= control target key start
LH: loop header
LB: loop body
LE: loop exit
PB: predicated region body
PF: predicated region fallthrough
CT: control target
= control target key end

     0   :  { %s747_s19 = smov 1   ;;  %s1012_s0 = inlined_call_operand.vmem [shape: f32[2,4,16], index: 0, kind: input, shape index: {}]   ;;  %s1013_s1 = inlined_call_operand.vmem [shape: f32[4,8,4], index: 1, kind: input, shape index: {}]   ;;  %s1014_s2 = inlined_call_operand.vmem [shape: f32[4,8,1], index: 2, kind: input, shape index: {}]   ;;  %s1015_s3 = inlined_call_operand.vmem [shape: f32[8,24], index: 3, kind: input, shape index: {}]   ;;  %s1016_s4 = inlined_call_operand.vmem [shape: f32[8,1], index: 4, kind: input, shape index: {}]   ;;  %s1017_s5 = inlined_call_operand.vmem [shape: f32[8,32], index: 5, kind: input, shape index: {}]   ;;  %s1018_s6 = inlined_call_operand.vmem [shape: f32[8,1], index: 6, kind: input, shape index: {}]   ;;  %s1019_s7 = inlined_call_operand.vmem [shape: f32[6,8,1], index: 7, kind: input, shape index: {}]   ;;  %s1020_s8 = inlined_call_operand.vmem [shape: f32[6,8,1], index: 8, kind: input, shape index: {}]   ;;  %s1021_s9 = inlined_call_operand.vmem [shape: f32[16,32], index: 9, kind: input, shape index: {}]   ;;  %s1022_s10 = inlined_call_operand.vmem [shape: f32[16,1], index: 10, kind: input, shape index: {}]   ;;  %s1023_s11 = inlined_call_operand.hbm [shape: f32[2,16,16], index: 11, kind: output, shape index: {}]  }
   0x1   :  { %v41_v0 = vld [vmem:[%s1012_s0] sm:$0xf] }
   0x2   :  { %43 = vrot.lane.b32.xlu0 %v41_v0, %s747_s19 }
   0x3   :  { %16 = vsyncpa [#allocation6], 0  ;;  %v656_v1 = vld [vmem:[%s1012_s0 + $0x4] sm:$0xf]  ;;  %s748_s22 = smov 20   ;;  %vm39_vm0 = vcmask 306176   ;;  %v57_v11 = vlaneseq }
   0x4   :  { %v749_v2 = vmov 0.0   ;;  %v660_v3 = vld [vmem:[%s1014_s2 + $0x8] sm:$0xff]  ;;  %v750_v4 = vmov 0   ;;  %v667_v5 = vld [vmem:[%s1014_s2 + $0x10] sm:$0xff]  ;;  %vm46_vm1 = vcmask 134152   ;;  %vm54_vm2 = vcmask 289952  }
   0x5   :  { %40 = vst.msk [vmem:[#allocation2] sm:$0xf] %vm39_vm0, %v749_v2  ;;  %702 = vset.pattern.permute.xlu1 %v750_v4  ;;  %703 = vset.pattern.permute.xlu2 %v750_v4  ;;  %vm77_vm3 = vcmask 1043456   ;;  %vm73_vm4 = vcmask 31744   ;;  %v659_v8 = vld [vmem:[%s1013_s1 + $0x8] sm:$0xff]  ;;  %v666_v10 = vld [vmem:[%s1013_s1 + $0x10] sm:$0xff] }
   0x6   :  { %107 = vperm.xlu1 %702, %v660_v3   ;;  %704 = vset.pattern.permute.xlu0 %v750_v4  ;;  %v58_v12 = vand.u32 127, %v57_v11  ;;  %vm138_vm11 = vcmask 310272   ;;  %v751_v23 = vmov 32.0   ;;  %v752_v25 = vmov 38.0   ;;  %v133_v27 = vld [vmem:[%s1019_s7] sm:$0xff]  ;;  %v670_v37 = vld [vmem:[%s1019_s7 + $0x10] sm:$0xff] }
   0x7   :  { %705 = vrcp.f32 %v751_v23  ;;  %v134_v32 = vld [vmem:[%s1020_s8] sm:$0xff]  ;;  %v671_v45 = vld [vmem:[%s1020_s8 + $0x10] sm:$0xff]  ;;  %vm185_vm15 = vcmask 334848   ;;  %s753_s20 = smov 126   ;;  %s754_s23 = smov 127   ;;  %v665_v16 = vld [vmem:[%s1020_s8 + $0x8] sm:$0xff] }
   0x8   :  { %vm59_vm5 = vcmp.ge.s32.totalorder %v58_v12, 1  ;;  %vm60_vm6 = vcmp.le.s32.totalorder %v58_v12, 16  ;;  %vm62_vm7 = vcmp.ge.s32.totalorder %v58_v12, 20  ;;  %vm63_vm8 = vcmp.le.s32.totalorder %v58_v12, 35  ;;  %186 = vst.msk [vmem:[#allocation4] sm:$0xff] %vm185_vm15, %v749_v2  ;;  %s755_s24 = smov 125  }
   0x9   :  { %vm61_vm9 = vmand %vm59_vm5, %vm60_vm6  ;;  %707 = vrcp.f32 %v752_v25  ;;  %s644_s16 = sshll.u32 %s1023_s11, 4  ;;  %s758_s17 = smov 128   ;;  %s645_s16 = int_to_ptr.hbm [resolvable:$true] %s644_s16 }
   0xa   :  { %51 = vrot.lane.b32.xlu0 %v656_v1, %s748_s22  ;;  %vm64_vm10 = vmand %vm62_vm7, %vm63_vm8  ;;  %vm191_vm8 = vcmask 318472  }
   0xb   :  { %vm850_vm12 = vmor %vm61_vm9, %vm64_vm10  ;;  %vm479_vm9 = vcmask 330752   ;;  %vm485_vm10 = vcmask 314376  }
   0xc   :  { %480 = vst.msk [vmem:[#allocation3] sm:$0xf] %vm479_vm9, %v749_v2  ;;  %vm626_vm9 = vcmask 130048  }
   0xd   :  { %v706_v24 = vpop.eup %705 }
   0xe   :  { %277 = vperm.xlu1 %702, %v667_v5   ;;  %v143_v26 = vmul.f32 32.0, %v706_v24  ;;  %vm147_vm13 = vweird.f32 %v706_v24 }
   0xf   :  { %v708_v29 = vpop.eup %707 }
  0x10   :  { %v144_v28 = vsub.f32 1.0, %v143_v26  ;;  %v311_v31 = vmul.f32 38.0, %v708_v29  ;;  %vm315_vm14 = vweird.f32 %v708_v29  ;;  %v349_v26 = vld [vmem:[%s1018_s6] sm:$0xff] }
  0x12   :  { %v145_v30 = vmul.f32 %v706_v24, %v144_v28  ;;  %v312_v34 = vsub.f32 1.0, %v311_v31  ;;  %v673_v28 = vld [vmem:[%s1019_s7 + $0x18] sm:$0xff] }
  0x13   :  { %v678_v31 = vld [vmem:[%s1014_s2 + $0x18] sm:$0xff] }
  0x14   :  { %v146_v33 = vadd.f32 %v706_v24, %v145_v30  ;;  %v313_v36 = vmul.f32 %v708_v29, %v312_v34 }
  0x16   :  { %v864_v35 = vsel %vm147_vm13, %v706_v24, %v146_v33  ;;  %v314_v40 = vadd.f32 %v708_v29, %v313_v36  ;;  %v66_v33 = vld [vmem:[%s1013_s1] sm:$0xff]  ;;  %vm372_vm13 = vcmask 261120  }
  0x18   :  { %v316_v43 = vsel %vm315_vm14, %v708_v29, %v314_v40  ;;  %v674_v29 = vld [vmem:[%s1020_s8 + $0x18] sm:$0xff]  ;;  %vm206_vm14 = vcmask 195584  }
  0x74   :  { %v44_v6 = vpop.permute.xlu0 %43 }
  0x75   :  { %47 = vst.msk [vmem:[#allocation2] sm:$0xf] %vm46_vm1, %v44_v6 }
  0x78   :  { %v108_v13 = vpop.permute.xlu1 %107 }
  0x7c   :  { %v52_v7 = vpop.permute.xlu0 %51 }
  0x7d   :  { %55 = vst.msk [vmem:[#allocation2] sm:$0xf] %vm54_vm2, %v52_v7 }
  0x80   :  { %v278_v19 = vpop.permute.xlu1 %277 }
  0x84   :  { %v837_v9 = vld [vmem:[#allocation2] sm:$0xf] }
  0x85   :  { %657 = vmatpush.msk.msra.mxu0 %vm77_vm3, %v837_v9  ;;  %661 = vmatpush.msk.msra.mxu1 %vm77_vm3, %v837_v9  ;;  %v478_v30 = vsel %vm850_vm12, %v837_v9, -1e+30 }
  0x86   :  { %668 = vmatpush.msk.msra.mxu3 %vm77_vm3, %v837_v9  ;;  %662 = vmatmul.msk.f32.vlgmr.msra.gmra.mxu1 %vm73_vm4, %v659_v8 }
  0x87   :  { %669 = vmatmul.msk.f32.vlgmr.msra.gmra.mxu3 %vm73_vm4, %v666_v10  ;;  %658 = vmatmul.msk.f32.vlgmr.msra.gmra.mxu0 %vm73_vm4, %v66_v33 }
 0x103   :  { %v130_v14 = vpop.f32.mrf.mxu1 }
 0x104   :  { %v131_v15 = vadd.f32 %v130_v14, %v108_v13 }
 0x106   :  { %v137_v17 = vsel %vm850_vm12, %v131_v15, 0.0 }
 0x107   :  { %v139_v18 = vsel %vm138_vm11, %v137_v17, 0.0 }
 0x108   :  { %140 = vadd.xlane.f32.xlu2 %v139_v18 }
 0x10a   :  { %v300_v20 = vpop.f32.mrf.mxu3 }
 0x10b   :  { %v301_v21 = vadd.f32 %v300_v20, %v278_v19 }
 0x10d   :  { %v307_v22 = vsel %vm138_vm11, %v301_v21, 0.0 }
 0x110   :  { %308 = vadd.xlane.f32.xlu2 %v307_v22 }
 0x128   :  { %171 = vperm.xlu2 %703, %v133_v27  }
 0x130   :  { %177 = vperm.xlu2 %703, %v134_v32   ;;  %v184_v32 = vld [vmem:[%s1016_s4] sm:$0xff]  ;;  %s756_s4 = smov 108  }
 0x138   :  { %338 = vperm.xlu2 %703, %v670_v37  }
 0x140   :  { %344 = vperm.xlu2 %703, %v671_v45   ;;  %v677_v45 = vld [vmem:[%s1013_s1 + $0x18] sm:$0xff] }
 0x17b   :  { %v141_v38 = vpop.xlane.xlu2 %140 }
 0x17c   :  { %v149_v39 = vmul.f32 %v864_v35, %v141_v38 }
 0x17e   :  { %v150_v41 = vsub.f32 %v131_v15, %v149_v39 }
 0x180   :  { %v151_v42 = vsel %vm850_vm12, %v150_v41, 0.0 }
 0x181   :  { %v152_v44 = vmul.f32 %v151_v42, %v151_v42 }
 0x183   :  { %v309_v46 = vpop.xlane.xlu2 %308  ;;  %v153_v47 = vsel %vm138_vm11, %v152_v44, 0.0 }
 0x184   :  { %v317_v48 = vmul.f32 %v316_v43, %v309_v46  ;;  %154 = vadd.xlane.f32.xlu0 %v153_v47  ;;  %v929_v47 = vpop.f32.mrf.mxu0 }
 0x186   :  { %v318_v49 = vsub.f32 %v301_v21, %v317_v48 }
 0x188   :  { %v319_v50 = vmul.f32 %v318_v49, %v318_v49 }
 0x18a   :  { %v320_v51 = vsel %vm138_vm11, %v319_v50, 0.0 }
 0x18b   :  { %321 = vadd.xlane.f32.xlu1 %v320_v51  ;;  %v172_v54 = vpop.permute.xlu2 %171 }
 0x193   :  { %v178_v61 = vpop.permute.xlu2 %177 }
 0x19b   :  { %v339_v7 = vpop.permute.xlu2 %338 }
 0x1a3   :  { %v345_v21 = vpop.permute.xlu2 %344 }
 0x1f7   :  { %v155_v52 = vpop.xlane.xlu0 %154 }
 0x1f8   :  { %v156_v53 = vmul.f32 %v155_v52, %v864_v35 }
 0x1fa   :  { %v157_v55 = vadd.f32 1e-05, %v156_v53 }
 0x1fc   :  { %709 = vrsqrt.f32 %v157_v55  ;;  %vm164_vm1 = vweird.f32 %v157_v55 }
 0x1fe   :  { %v322_v56 = vpop.xlane.xlu1 %321 }
 0x1ff   :  { %v323_v57 = vmul.f32 %v322_v56, %v316_v43 }
 0x201   :  { %v324_v58 = vadd.f32 1e-05, %v323_v57 }
 0x202   :  { %v710_v59 = vpop.eup %709 }
 0x203   :  { %v159_v60 = vmul.f32 %v710_v59, %v157_v55  ;;  %711 = vrsqrt.f32 %v324_v58  ;;  %vm165_vm0 = vweird.f32 %v710_v59  ;;  %vm331_vm6 = vweird.f32 %v324_v58 }
 0x204   :  { %vm166_vm2 = vmor %vm164_vm1, %vm165_vm0 }
 0x205   :  { %v160_v62 = vmul.f32 %v710_v59, %v159_v60  ;;  %v682_v60 = vld [vmem:[%s1020_s8 + $0x28] sm:$0xff] }
 0x207   :  { %v161_v63 = vmul.f32 0.5, %v160_v62 }
 0x209   :  { %v712_v0 = vpop.eup %711  ;;  %v162_v1 = vsub.f32 1.5, %v161_v63 }
 0x20a   :  { %v326_v3 = vmul.f32 %v712_v0, %v324_v58  ;;  %vm332_vm5 = vweird.f32 %v712_v0 }
 0x20b   :  { %v163_v4 = vmul.f32 %v710_v59, %v162_v1  ;;  %vm333_vm7 = vmor %vm331_vm6, %vm332_vm5 }
 0x20c   :  { %v327_v5 = vmul.f32 %v712_v0, %v326_v3 }
 0x20d   :  { %v167_v6 = vsel %vm166_vm2, %v710_v59, %v163_v4  ;;  %v67_v4 = vld [vmem:[%s1014_s2] sm:$0xff] }
 0x20e   :  { %v328_v8 = vmul.f32 0.5, %v327_v5  ;;  %v168_v10 = vmul.f32 %v167_v6, %v150_v41  ;;  %v183_v41 = vld [vmem:[%s1015_s3] sm:$0xff] }
 0x210   :  { %v329_v11 = vsub.f32 1.5, %v328_v8  ;;  %v174_v12 = vmul.f32 %v172_v54, %v168_v10 }
 0x212   :  { %v330_v13 = vmul.f32 %v712_v0, %v329_v11  ;;  %v180_v14 = vadd.f32 %v178_v61, %v174_v12  ;;  %v681_v11 = vld [vmem:[%s1019_s7 + $0x28] sm:$0xff] }
 0x213   :  { %v664_v12 = vld [vmem:[%s1019_s7 + $0x8] sm:$0xff] }
 0x214   :  { %v334_v15 = vsel %vm333_vm7, %v712_v0, %v330_v13  ;;  %v181_v17 = vmax.f32 %v180_v14, 0.0  ;;  %v676_v13 = vld [vmem:[%s1020_s8 + $0x20] sm:$0xff] }
 0x215   :  { %v335_v18 = vmul.f32 %v334_v15, %v318_v49 }
 0x216   :  { %v182_v19 = vsel %vm850_vm12, %v181_v17, 0.0 }
 0x217   :  { %v341_v20 = vmul.f32 %v339_v7, %v335_v18  ;;  %188 = vrot.lane.b32.xlu0 %v182_v19, %s747_s19 }
 0x219   :  { %v347_v22 = vadd.f32 %v345_v21, %v341_v20 }
 0x21b   :  { %352 = vrot.lane.b32.xlu1 %v347_v22, %s747_s19 }
 0x289   :  { %v189_v23 = vpop.permute.xlu0 %188 }
 0x28a   :  { %192 = vst.msk [vmem:[#allocation4] sm:$0xff] %vm191_vm8, %v189_v23 }
 0x28d   :  { %v353_v25 = vpop.permute.xlu1 %352 }
 0x291   :  { %v193_v24 = vld [vmem:[#allocation4] sm:$0xff] }
 0x292   :  { %350 = vst.msk [vmem:[#allocation4] sm:$0xff] %vm185_vm15, %v749_v2  ;;  %198 = vrot.lane.b32.xlu1 %v193_v24, %s753_s20  ;;  %v348_v2 = vld [vmem:[%s1017_s5] sm:$0xff] }
 0x293   :  { %355 = vst.msk [vmem:[#allocation4] sm:$0xff] %vm191_vm8, %v353_v25 }
 0x29a   :  { %369 = vperm.xlu1 %702, %v349_v26   ;;  %v356_v27 = vld [vmem:[#allocation4] sm:$0xff] }
 0x29b   :  { %358 = vrot.lane.b32.xlu0 %v356_v27, %s754_s23  ;;  %364 = vrot.lane.b32.xlu2 %v356_v27, %s755_s24 }
 0x2a2   :  { %426 = vperm.xlu1 %702, %v673_v28  }
 0x2a3   :  { %195 = vrot.lane.b32.xlu0 %v193_v24, %s754_s23  ;;  %361 = vrot.lane.b32.xlu2 %v356_v27, %s753_s20 }
 0x2aa   :  { %432 = vperm.xlu1 %702, %v674_v29  }
 0x2ab   :  { %482 = vrot.lane.b32.xlu2 %v478_v30, %s747_s19 }
 0x2b2   :  { %501 = vperm.xlu1 %702, %v678_v31  }
 0x2ba   :  { %203 = vperm.xlu1 %702, %v184_v32  }
 0x2f5   :  { %v365_v9 = vpop.permute.xlu2 %364 }
 0x2f6   :  { %388 = vmatpush.msrb.mxu0 %v365_v9 }
 0x2fd   :  { %v362_v34 = vpop.permute.xlu2 %361 }
 0x2fe   :  { %389 = vmatpush.msrb.mxu0 %v362_v34 }
 0x304   :  { %v199_v36 = vpop.permute.xlu1 %198 }
 0x305   :  { %v483_v37 = vpop.permute.xlu2 %482  ;;  %223 = vmatpush.msra.mxu2 %v199_v36 }
 0x306   :  { %486 = vst.msk [vmem:[#allocation3] sm:$0xf] %vm485_vm10, %v483_v37 }
 0x30c   :  { %v370_v48 = vpop.permute.xlu1 %369 }
 0x30d   :  { %v359_v38 = vpop.permute.xlu0 %358  ;;  %v487_v39 = vld [vmem:[#allocation3] sm:$0xf] }
 0x30e   :  { %490 = vrot.lane.b32.xlu2 %v487_v39, %s753_s20  ;;  %390 = vmatpush.msrb.mxu0 %v359_v38  ;;  %v488_v42 = vmax.f32 %v487_v39, %v478_v30 }
 0x310   :  { %391 = vmatpush.msrb.mxu0 %v356_v27 }
 0x311   :  { %672 = vmatmul.msk.f32.vlgmr.msrb.gmra.mxu0 %vm372_vm13, %v348_v2 }
 0x314   :  { %v427_v53 = vpop.permute.xlu1 %426 }
 0x315   :  { %v196_v40 = vpop.permute.xlu0 %195 }
 0x316   :  { %224 = vmatpush.msra.mxu2 %v196_v40 }
 0x318   :  { %225 = vmatpush.msra.mxu2 %v193_v24 }
 0x319   :  { %663 = vmatmul.msk.f32.vlgmr.msra.gmra.mxu2 %vm206_vm14, %v183_v41 }
 0x31c   :  { %v433_v54 = vpop.permute.xlu1 %432 }
 0x324   :  { %v502_v55 = vpop.permute.xlu1 %501 }
 0x32c   :  { %v204_v5 = vpop.permute.xlu1 %203 }
 0x368   :  { %v491_v43 = vpop.permute.xlu2 %490 }
 0x369   :  { %v493_v44 = vmax.f32 %v488_v42, %v491_v43  ;;  %v675_v42 = vld [vmem:[%s1019_s7 + $0x20] sm:$0xff] }
 0x36b   :  { %v494_v46 = vsel %vm850_vm12, %v493_v44, 0.0 }
 0x36c   :  { %679 = vmatpush.msk.msrb.mxu1 %vm77_vm3, %v494_v46 }
 0x36d   :  { %680 = vmatmul.msk.f32.vlgmr.msrb.gmra.mxu1 %vm73_vm4, %v677_v45  ;;  %v577_v45 = vld [vmem:[%s1022_s10] sm:$0xff] }
 0x38e   :  { %v393_v49 = vpop.f32.mrf.mxu0 }
 0x38f   :  { %v394_v50 = vadd.f32 %v393_v49, %v370_v48 }
 0x391   :  { %v400_v51 = vsel %vm850_vm12, %v394_v50, 0.0 }
 0x392   :  { %v401_v52 = vsel %vm138_vm11, %v400_v51, 0.0 }
 0x393   :  { %402 = vadd.xlane.f32.xlu0 %v401_v52 }
 0x39c   :  { %v227_v1 = vpop.f32.mrf.mxu2 }
 0x39d   :  { %v228_v7 = vadd.f32 %v227_v1, %v204_v5 }
 0x39f   :  { %v234_v8 = vsel %vm850_vm12, %v228_v7, 0.0 }
 0x3a0   :  { %v235_v10 = vsel %vm138_vm11, %v234_v8, 0.0 }
 0x3ea   :  { %v527_v56 = vpop.f32.mrf.mxu1 }
 0x3eb   :  { %v528_v57 = vadd.f32 %v527_v56, %v502_v55 }
 0x3ed   :  { %v534_v58 = vsel %vm850_vm12, %v528_v57, 0.0 }
 0x3ee   :  { %v535_v59 = vsel %vm138_vm11, %v534_v58, 0.0 }
 0x3ef   :  { %536 = vadd.xlane.f32.xlu1 %v535_v59 }
 0x406   :  { %v403_v61 = vpop.xlane.xlu0 %402 }
 0x407   :  { %v404_v62 = vmul.f32 %v403_v61, %v864_v35 }
 0x408   :  { %566 = vperm.xlu1 %702, %v682_v60  }
 0x409   :  { %v405_v63 = vsub.f32 %v394_v50, %v404_v62 }
 0x40b   :  { %v406_v0 = vsel %vm850_vm12, %v405_v63, 0.0 }
 0x40c   :  { %v407_v3 = vmul.f32 %v406_v0, %v406_v0 }
 0x40e   :  { %v408_v6 = vsel %vm138_vm11, %v407_v3, 0.0 }
 0x40f   :  { %409 = vadd.xlane.f32.xlu2 %v408_v6 }
 0x410   :  { %70 = vperm.xlu1 %702, %v67_v4   ;;  %v578_v4 = vld [vmem:[%s1022_s10 + $0x8] sm:$0xff] }
 0x417   :  { %236 = vadd.xlane.f32.xlu2 %v235_v10 }
 0x42f   :  { %560 = vperm.xlu2 %703, %v681_v11  }
 0x437   :  { %260 = vperm.xlu2 %703, %v664_v12  }
 0x43f   :  { %473 = vperm.xlu2 %703, %v676_v13  }
 0x462   :  { %v537_v24 = vpop.xlane.xlu1 %536 }
 0x463   :  { %v538_v27 = vmul.f32 %v537_v24, %v864_v35 }
 0x465   :  { %v539_v30 = vsub.f32 %v528_v57, %v538_v27 }
 0x467   :  { %v540_v36 = vsel %vm850_vm12, %v539_v30, 0.0 }
 0x468   :  { %v541_v37 = vmul.f32 %v540_v36, %v540_v36 }
 0x46a   :  { %v542_v39 = vsel %vm138_vm11, %v541_v37, 0.0 }
 0x47a   :  { %v567_v0 = vpop.permute.xlu1 %566 }
 0x482   :  { %v410_v14 = vpop.xlane.xlu2 %409  ;;  %v71_v37 = vpop.permute.xlu1 %70 }
 0x483   :  { %v411_v15 = vmul.f32 %v410_v14, %v864_v35 }
 0x485   :  { %v412_v17 = vadd.f32 1e-05, %v411_v15 }
 0x487   :  { %713 = vrsqrt.f32 %v412_v17  ;;  %vm419_vm4 = vweird.f32 %v412_v17 }
 0x48a   :  { %v237_v32 = vpop.xlane.xlu2 %236 }
 0x48b   :  { %v238_v34 = vmul.f32 %v237_v32, %v864_v35 }
 0x48d   :  { %v714_v18 = vpop.eup %713  ;;  %v967_v38 = vsub.f32 %v228_v7, %v238_v34 }
 0x48e   :  { %v414_v19 = vmul.f32 %v714_v18, %v412_v17  ;;  %vm420_vm3 = vweird.f32 %v714_v18 }
 0x48f   :  { %vm421_vm15 = vmor %vm419_vm4, %vm420_vm3  ;;  %v240_v2 = vsel %vm850_vm12, %v967_v38, 0.0 }
 0x490   :  { %v415_v20 = vmul.f32 %v714_v18, %v414_v19  ;;  %v241_v40 = vmul.f32 %v240_v2, %v240_v2 }
 0x492   :  { %v416_v21 = vmul.f32 0.5, %v415_v20  ;;  %v242_v41 = vsel %vm138_vm11, %v241_v40, 0.0  ;;  %v561_v62 = vpop.permute.xlu2 %560  ;;  %v99_v40 = vadd.f32 %v929_v47, %v71_v37 }
 0x494   :  { %v417_v22 = vsub.f32 1.5, %v416_v21 }
 0x496   :  { %v418_v23 = vmul.f32 %v714_v18, %v417_v22 }
 0x498   :  { %v422_v25 = vsel %vm421_vm15, %v714_v18, %v418_v23 }
 0x499   :  { %v423_v26 = vmul.f32 %v422_v25, %v405_v63 }
 0x49a   :  { %v261_v8 = vpop.permute.xlu2 %260 }
 0x49b   :  { %v429_v28 = vmul.f32 %v427_v53, %v423_v26 }
 0x49d   :  { %v435_v29 = vadd.f32 %v433_v54, %v429_v28 }
 0x49f   :  { %v436_v31 = vmax.f32 %v435_v29, 0.0 }
 0x4a1   :  { %v441_v33 = vsel %vm850_vm12, %v436_v31, 0.0 }
 0x4a2   :  { %v442_v9 = vsel %vm138_vm11, %v441_v33, 0.0  ;;  %v474_v11 = vpop.permute.xlu2 %473 }
 0x4a3   :  { %443 = vadd.xlane.f32.xlu0 %v442_v9 }
 0x4ab   :  { %543 = vadd.xlane.f32.xlu0 %v542_v39 }
 0x4b3   :  { %243 = vadd.xlane.f32.xlu0 %v242_v41 }
 0x4c7   :  { %467 = vperm.xlu0 %704, %v675_v42   ;;  %v571_v42 = vmax.f32 %v99_v40, 0.0 }
 0x4cf   :  { %581 = vperm.xlu0 %704, %v577_v45  }
 0x516   :  { %v444_v43 = vpop.xlane.xlu0 %443 }
 0x517   :  { %v445_v44 = vmul.f32 %v444_v43, %v864_v35  ;;  %v575_v43 = vld [vmem:[%s1021_s9] sm:$0xff] }
 0x519   :  { %v981_v46 = vsub.f32 %v436_v31, %v445_v44  ;;  %v576_v44 = vld [vmem:[%s1021_s9 + $0x8] sm:$0xff]  ;;  %s757_s9 = smov [#allocation5]  }
 0x51a   :  { %s642_s19 = sshll.u32 %s757_s9, 4  ;;  %s643_s19 = int_to_ptr.vmem [resolvable:$true] %s642_s19 }
 0x51b   :  { %v447_v48 = vsel %vm850_vm12, %v981_v46, 0.0 }
 0x51c   :  { %v448_v49 = vmul.f32 %v447_v48, %v447_v48 }
 0x51e   :  { %v544_v50 = vpop.xlane.xlu0 %543  ;;  %v449_v51 = vsel %vm138_vm11, %v448_v49, 0.0 }
 0x51f   :  { %v545_v52 = vmul.f32 %v544_v50, %v864_v35  ;;  %450 = vadd.xlane.f32.xlu2 %v449_v51 }
 0x521   :  { %v546_v53 = vadd.f32 1e-05, %v545_v52 }
 0x523   :  { %715 = vrsqrt.f32 %v546_v53  ;;  %vm553_vm1 = vweird.f32 %v546_v53 }
 0x526   :  { %v244_v6 = vpop.xlane.xlu0 %243 }
 0x527   :  { %v245_v7 = vmul.f32 %v244_v6, %v864_v35 }
 0x529   :  { %v716_v54 = vpop.eup %715  ;;  %v246_v10 = vadd.f32 1e-05, %v245_v7 }
 0x52a   :  { %v548_v55 = vmul.f32 %v716_v54, %v546_v53  ;;  %vm554_vm0 = vweird.f32 %v716_v54 }
 0x52b   :  { %vm555_vm2 = vmor %vm553_vm1, %vm554_vm0  ;;  %717 = vrsqrt.f32 %v246_v10  ;;  %vm253_vm12 = vweird.f32 %v246_v10 }
 0x52c   :  { %v549_v56 = vmul.f32 %v716_v54, %v548_v55 }
 0x52e   :  { %v550_v57 = vmul.f32 0.5, %v549_v56 }
 0x530   :  { %v551_v58 = vsub.f32 1.5, %v550_v57 }
 0x531   :  { %v718_v12 = vpop.eup %717 }
 0x532   :  { %v552_v59 = vmul.f32 %v716_v54, %v551_v58  ;;  %v248_v13 = vmul.f32 %v718_v12, %v246_v10  ;;  %vm254_vm11 = vweird.f32 %v718_v12 }
 0x533   :  { %vm255_vm5 = vmor %vm253_vm12, %vm254_vm11 }
 0x534   :  { %v556_v60 = vsel %vm555_vm2, %v716_v54, %v552_v59  ;;  %v249_v14 = vmul.f32 %v718_v12, %v248_v13 }
 0x535   :  { %v557_v61 = vmul.f32 %v556_v60, %v539_v30 }
 0x536   :  { %v250_v19 = vmul.f32 0.5, %v249_v14 }
 0x537   :  { %266 = vperm.xlu2 %703, %v665_v16   ;;  %v563_v63 = vmul.f32 %v561_v62, %v557_v61 }
 0x538   :  { %v251_v20 = vsub.f32 1.5, %v250_v19 }
 0x539   :  { %v569_v1 = vadd.f32 %v567_v0, %v563_v63  ;;  %v468_v33 = vpop.permute.xlu0 %467 }
 0x53a   :  { %v252_v23 = vmul.f32 %v718_v12, %v251_v20 }
 0x53b   :  { %v570_v3 = vmax.f32 %v569_v1, 0.0 }
 0x53c   :  { %v256_v26 = vsel %vm255_vm5, %v718_v12, %v252_v23 }
 0x53d   :  { %v574_v5 = vmax.f32 %v570_v3, 0.0  ;;  %v257_v28 = vmul.f32 %v256_v26, %v967_v38 }
 0x53f   :  { %586 = vperm.xlu2 %703, %v578_v4   ;;  %607 = vmatpush.msrb.mxu2 %v574_v5  ;;  %v263_v31 = vmul.f32 %v261_v8, %v257_v28 }
 0x540   :  { %685 = vmatpush.msrb.mxu3 %v574_v5 }
 0x541   :  { %v582_v45 = vpop.permute.xlu0 %581 }
 0x592   :  { %v451_v15 = vpop.xlane.xlu2 %450 }
 0x593   :  { %v452_v17 = vmul.f32 %v451_v15, %v864_v35 }
 0x595   :  { %v453_v18 = vadd.f32 1e-05, %v452_v17 }
 0x597   :  { %719 = vrsqrt.f32 %v453_v18  ;;  %vm460_vm7 = vweird.f32 %v453_v18 }
 0x59a   :  { %v267_v35 = vpop.permute.xlu2 %266 }
 0x59b   :  { %v269_v9 = vadd.f32 %v267_v35, %v263_v31 }
 0x59d   :  { %v720_v21 = vpop.eup %719  ;;  %v270_v39 = vmax.f32 %v269_v9, 0.0 }
 0x59e   :  { %v455_v22 = vmul.f32 %v720_v21, %v453_v18  ;;  %vm461_vm6 = vweird.f32 %v720_v21 }
 0x59f   :  { %vm462_vm8 = vmor %vm460_vm7, %vm461_vm6  ;;  %v572_v38 = vmax.f32 %v270_v39, 0.0 }
 0x5a0   :  { %v456_v24 = vmul.f32 %v720_v21, %v455_v22 }
 0x5a2   :  { %v457_v25 = vmul.f32 0.5, %v456_v24  ;;  %v587_v47 = vpop.permute.xlu2 %586 }
 0x5a4   :  { %v458_v27 = vsub.f32 1.5, %v457_v25 }
 0x5a6   :  { %v459_v29 = vmul.f32 %v720_v21, %v458_v27 }
 0x5a8   :  { %v463_v30 = vsel %vm462_vm8, %v720_v21, %v459_v29 }
 0x5a9   :  { %v464_v32 = vmul.f32 %v463_v30, %v981_v46 }
 0x5ab   :  { %v470_v34 = vmul.f32 %v468_v33, %v464_v32 }
 0x5ad   :  { %v476_v36 = vadd.f32 %v474_v11, %v470_v34 }
 0x5af   :  { %v477_v2 = vmax.f32 %v476_v36, 0.0 }
 0x5b1   :  { %v573_v41 = vmax.f32 %v477_v2, 0.0 }
 0x5b3   :  { %608 = vmatpush.msrb.mxu2 %v573_v41  ;;  %686 = vmatpush.msrb.mxu3 %v573_v41 }
 0x5b5   :  { %609 = vmatpush.msrb.mxu2 %v572_v38  ;;  %687 = vmatpush.msrb.mxu3 %v572_v38 }
 0x5b7   :  { %610 = vmatpush.msrb.mxu2 %v571_v42  ;;  %688 = vmatpush.msrb.mxu3 %v571_v42 }
 0x5b8   :  { %683 = vmatmul.msk.f32.vlgmr.msrb.gmra.mxu2 %vm372_vm13, %v575_v43  ;;  %684 = vmatmul.msk.f32.vlgmr.msrb.gmra.mxu3 %vm372_vm13, %v576_v44 }
 0x63b   :  { %v612_v46 = vpop.f32.mrf.mxu2  ;;  %v615_v48 = vpop.f32.mrf.mxu3 }
 0x63c   :  { %v613_v49 = vadd.f32 %v612_v46, %v582_v45  ;;  %v616_v50 = vadd.f32 %v615_v48, %v587_v47 }
 0x63e   :  { %622 = vrot.lane.b32.xlu0 %v616_v50, %s754_s23  ;;  %629 = vrot.lane.b32.xlu2 %v613_v49, %s756_s4 }
 0x63f   :  { %620 = vrot.lane.b32.xlu1 %v613_v49, %s754_s23  ;;  %s759_s23 = smov 8  }
 0x647   :  { %631 = vrot.lane.b32.xlu1 %v616_v50, %s756_s4 }
 0x698   :  { %v630_v51 = vpop.permute.xlu2 %629 }
 0x699   :  { %636 = vst.msk [vmem:[#allocation5 + $0x10] sm:$0xff] %vm626_vm9, %v630_v51 }
 0x6b0   :  { %v623_v52 = vpop.permute.xlu0 %622 }
 0x6b1   :  { %628 = vst.msk [vmem:[#allocation5 + $0x8] sm:$0xff] %vm626_vm9, %v623_v52  ;;  %v621_v53 = vpop.permute.xlu1 %620 }
 0x6b2   :  { %627 = vst.msk [vmem:[#allocation5] sm:$0xff] %vm626_vm9, %v621_v53 }
 0x6b9   :  { %v632_v54 = vpop.permute.xlu1 %631 }
 0x6ba   :  { %637 = vst.msk [vmem:[#allocation5 + $0x18] sm:$0xff] %vm626_vm9, %v632_v54 }
 0x6bb   :  { %650 = dma.vmem_to_hbm [thread:$0]  %s643_s19, 512, %s645_s16, [#allocation6], %s758_s17, %s758_s17, %s759_s23  }
 0x6bc   :  { %745 = dma.done.wait [#allocation6], 512  }
 0x6bd   :  { %746 = vsyncadd [#allocation6], 4294966784 }
 0x6be   :  { %655 = vsyncpa [#allocation6], 1 }

</bundles_post_ra>
